<compile_context>
chip_gen: v7x
topology: tpu7x:2x2x1
jax: 0.10.0
libtpu: 0.0.40
codegen_flags: <defaults>
</compile_context>

<pallas_src>
import functools

import jax
import jax.numpy as jnp
from jax.experimental import pallas as pl
from jax.experimental.pallas import tpu as pltpu


def _layernorm_kernel(x_ref, alpha_ref, bias_ref, o_ref, *, eps, d_valid):
    x = x_ref[...].astype(jnp.float32)                        # (TR, Dp)
    dp = x.shape[-1]

    # Single lane mask: padded lanes of a ragged block are *garbage* (the array
    # is not padded in HBM any more), so zero them once and reuse the masked
    # tensor for the mean, the sum-of-squares and the output write (padded
    # output lanes are dropped by Pallas anyway).
    if d_valid != dp:
        lane = jax.lax.broadcasted_iota(jnp.int32, x.shape, 1)
        x = jnp.where(lane < d_valid, x, 0.0)

    inv_n = 1.0 / d_valid
    s = jnp.sum(x, axis=-1, keepdims=True)                    # (TR, 1)
    ss = jnp.sum(x * x, axis=-1, keepdims=True)               # (TR, 1)
    mean = s * inv_n
    # torch.std defaults to the unbiased estimator (divide by N-1).
    # Fused one-pass variance; clamp guards the rare |mean| >> std cancellation.
    var = jnp.maximum(ss - d_valid * (mean * mean), 0.0) * (1.0 / (d_valid - 1))
    # Exact per-row scale: (TR,1) operand, so the exact divide is essentially
    # free in this HBM-bound kernel (no approx EUP error on every element).
    inv = 1.0 / (jnp.sqrt(var) + eps)                         # (TR, 1)

    alpha = alpha_ref[...].astype(jnp.float32)                # (1, Dp)
    bias = bias_ref[...].astype(jnp.float32)                  # (1, Dp)
    o_ref[...] = ((x - mean) * inv * alpha + bias).astype(o_ref.dtype)


def _round_up(v, m):
    return (v + m - 1) // m * m


def _vmem_budget():
    """(kernel VMEM byte budget for tiling, vmem_limit_bytes) per generation."""
    try:
        vmem = pltpu.get_tpu_info().vmem_capacity_bytes
    except Exception:  # pragma: no cover - conservative fallback
        vmem = 64 * 1024 * 1024
    if vmem >= 100 * 1024 * 1024:
        # v5e / v6e: 128 MiB physical VMEM.
        return 80 * 1024 * 1024, 96 * 1024 * 1024
    # v7x: 64 MiB per TensorCore.
    return 40 * 1024 * 1024, 48 * 1024 * 1024


def _choose_row_tile(rows, d_pad, itemsize, budget_bytes):
    """Row tile sized from the full VMEM footprint of one grid step.

    Footprint per tile row: double-buffered input + output blocks in the input
    dtype (4 * d_pad * itemsize) plus ~3 full-width f32 temporaries created in
    the kernel body (masked x, pre-cast output, slack) -> 12 * d_pad bytes.
    """
    sub = max(8, 32 // itemsize)          # packed sublane tile: 8/16/32
    bytes_per_row = 4 * d_pad * itemsize + 3 * d_pad * 4
    max_rows = (budget_bytes // bytes_per_row) // sub * sub
    if max_rows < sub:
        # TODO(synk): add a feature-dim-chunked reduction path for very wide
        # d_model instead of refusing (only triggers for d_model ~ 1M+).
        raise NotImplementedError(
            f"d_model too wide for single-block LayerNorm tile "
            f"(d_pad={d_pad}, budget={budget_bytes})"
        )
    tr = min(max_rows, _round_up(rows, sub))
    # Keep at least 2 grid steps so both v7x TensorCores get work (and the
    # pipeline has something to overlap); costs ~0.35us on single-TC parts.
    if rows > sub:
        tr = min(tr, _round_up((rows + 1) // 2, sub))
    return tr


def layer_norm(x, alpha, bias, eps=1e-6):
    """x: (..., d_model); alpha, bias: (d_model,). Returns same shape/dtype.

    Semantics intentionally match the torch module (unbiased std, eps added to
    std, not to var) -- slightly different from nn.LayerNorm.
    """
    orig_shape = x.shape
    d_model = orig_shape[-1]
    assert d_model > 1, "layer_norm requires d_model > 1 (unbiased std)"

    rows = 1
    for s in orig_shape[:-1]:
        rows *= s
    x2 = x.reshape(rows, d_model)
    alpha2 = alpha.reshape(1, d_model)
    bias2 = bias.reshape(1, d_model)

    d_pad = _round_up(d_model, 128)       # lane-dense block width
    itemsize = jnp.dtype(x.dtype).itemsize
    tile_budget, vmem_limit = _vmem_budget()
    tr = _choose_row_tile(rows, d_pad, itemsize, tile_budget)

    kernel = functools.partial(_layernorm_kernel, eps=eps, d_valid=d_model)
    out2 = pl.pallas_call(
        kernel,
        out_shape=jax.ShapeDtypeStruct((rows, d_model), x.dtype),
        grid_spec=pltpu.PrefetchScalarGridSpec(
            num_scalar_prefetch=0,
            grid=(pl.cdiv(rows, tr),),
            in_specs=[
                pl.BlockSpec((tr, d_pad), lambda i: (i, 0)),
                pl.BlockSpec((1, d_pad), lambda i: (0, 0)),
                pl.BlockSpec((1, d_pad), lambda i: (0, 0)),
            ],
            out_specs=pl.BlockSpec((tr, d_pad), lambda i: (i, 0)),
        ),
        compiler_params=pltpu.CompilerParams(
            dimension_semantics=("parallel",),
            vmem_limit_bytes=vmem_limit,
        ),
    )(x2, alpha2, bias2)

    return out2.reshape(orig_shape)


def layer_norm_ref(x, alpha, bias, eps=1e-6):
    """Pure-JAX reference matching the torch module (unbiased std)."""
    xf = x.astype(jnp.float32)
    mean = jnp.mean(xf, axis=-1, keepdims=True)
    xc = xf - mean
    var = jnp.sum(xc * xc, axis=-1, keepdims=True) / (x.shape[-1] - 1)
    std = jnp.sqrt(var)
    return (alpha * xc / (std + eps) + bias).astype(x.dtype)


if __name__ == "__main__":
    key = jax.random.PRNGKey(0)
    batch, seq, d_model = 2, 8, 32

    # deterministic example input + parameters (module __init__: ones / zeros)
    x = jax.random.normal(key, (batch, seq, d_model), dtype=jnp.float32)
    alpha = jnp.ones((d_model,), dtype=jnp.float32)
    bias = jnp.zeros((d_model,), dtype=jnp.float32)

    out = layer_norm(x, alpha, bias, eps=1e-6)
    out = jax.block_until_ready(out)

    ref = layer_norm_ref(x, alpha, bias, eps=1e-6)
    assert out.shape == x.shape and out.dtype == x.dtype
    err = float(jnp.max(jnp.abs(out - ref)))
    # exact per-row reciprocal now -> tight tolerance
    assert err < 1e-4, f"mismatch vs reference: {err}"

    print("KERNEL_OK")
</pallas_src>

<mosaic_0001>
module attributes {stable_mosaic.version = 11 : i64} {
  func.func @_layernorm_kernel(%arg0: i32, %arg1: memref<8x128xf32, #tpu.memory_space<vmem>>, %arg2: memref<1x128xf32, #tpu.memory_space<vmem>>, %arg3: memref<1x128xf32, #tpu.memory_space<vmem>>, %arg4: memref<8x128xf32, #tpu.memory_space<vmem>>) attributes {dimension_semantics = [#tpu.dimension_semantics<parallel>], iteration_bounds = array<i64: 2>, scalar_prefetch = 0 : i64, scratch_operands = 0 : i64, tpu.core_type = #tpu.core_type<tc>, window_params = [{transform_indices = @transform_0, window_bounds = array<i64: 8, 128>}, {transform_indices = @transform_1, window_bounds = array<i64: 1, 128>}, {transform_indices = @transform_2, window_bounds = array<i64: 1, 128>}, {transform_indices = @transform_3, window_bounds = array<i64: 8, 128>}]} {
    %c0 = arith.constant 0 : index
    %c0_0 = arith.constant 0 : index
    %0 = vector.load %arg1[%c0, %c0_0] : memref<8x128xf32, #tpu.memory_space<vmem>>, vector<8x128xf32>
    %1 = tpu.iota {dimensions = array<i32: 1>} : vector<8x128xi32>
    %c32_i32 = arith.constant 32 : i32
    %2 = vector.broadcast %c32_i32 : i32 to vector<8x128xi32>
    %3 = arith.cmpi slt, %1, %2 : vector<8x128xi32>
    %cst = arith.constant 0.000000e+00 : f32
    %4 = vector.broadcast %cst : f32 to vector<8x128xf32>
    %5 = arith.select %3, %0, %4 : vector<8x128xi1>, vector<8x128xf32>
    %cst_1 = arith.constant dense<0.000000e+00> : vector<8xf32>
    %6 = vector.multi_reduction <add>, %5, %cst_1 [1] : vector<8x128xf32> to vector<8xf32>
    %7 = vector.shape_cast %6 : vector<8xf32> to vector<8x1xf32>
    %8 = arith.mulf %5, %5 : vector<8x128xf32>
    %cst_2 = arith.constant dense<0.000000e+00> : vector<8xf32>
    %9 = vector.multi_reduction <add>, %8, %cst_2 [1] : vector<8x128xf32> to vector<8xf32>
    %10 = vector.shape_cast %9 : vector<8xf32> to vector<8x1xf32>
    %cst_3 = arith.constant 3.125000e-02 : f32
    %11 = vector.broadcast %cst_3 : f32 to vector<8x1xf32>
    %12 = arith.mulf %7, %11 : vector<8x1xf32>
    %13 = arith.mulf %12, %12 : vector<8x1xf32>
    %cst_4 = arith.constant 3.200000e+01 : f32
    %14 = vector.broadcast %cst_4 : f32 to vector<8x1xf32>
    %15 = arith.mulf %14, %13 : vector<8x1xf32>
    %16 = arith.subf %10, %15 : vector<8x1xf32>
    %cst_5 = arith.constant 0.000000e+00 : f32
    %17 = vector.broadcast %cst_5 : f32 to vector<8x1xf32>
    %18 = arith.maximumf %16, %17 : vector<8x1xf32>
    %cst_6 = arith.constant 0.0322580636 : f32
    %19 = vector.broadcast %cst_6 : f32 to vector<8x1xf32>
    %20 = arith.mulf %18, %19 : vector<8x1xf32>
    %21 = math.sqrt %20 : vector<8x1xf32>
    %cst_7 = arith.constant 9.99999997E-7 : f32
    %22 = vector.broadcast %cst_7 : f32 to vector<8x1xf32>
    %23 = arith.addf %21, %22 : vector<8x1xf32>
    %cst_8 = arith.constant 1.000000e+00 : f32
    %24 = vector.broadcast %cst_8 : f32 to vector<8x1xf32>
    %25 = arith.divf %24, %23 : vector<8x1xf32>
    %c0_9 = arith.constant 0 : index
    %c0_10 = arith.constant 0 : index
    %26 = vector.load %arg2[%c0_9, %c0_10] : memref<1x128xf32, #tpu.memory_space<vmem>>, vector<1x128xf32>
    %c0_11 = arith.constant 0 : index
    %c0_12 = arith.constant 0 : index
    %27 = vector.load %arg3[%c0_11, %c0_12] : memref<1x128xf32, #tpu.memory_space<vmem>>, vector<1x128xf32>
    %28 = vector.broadcast %12 : vector<8x1xf32> to vector<8x128xf32>
    %29 = arith.subf %5, %28 : vector<8x128xf32>
    %30 = vector.broadcast %25 : vector<8x1xf32> to vector<8x128xf32>
    %31 = arith.mulf %29, %30 : vector<8x128xf32>
    %32 = vector.broadcast %26 : vector<1x128xf32> to vector<8x128xf32>
    %33 = arith.mulf %31, %32 : vector<8x128xf32>
    %34 = vector.broadcast %27 : vector<1x128xf32> to vector<8x128xf32>
    %35 = arith.addf %33, %34 : vector<8x128xf32>
    %c0_13 = arith.constant 0 : index
    %c0_14 = arith.constant 0 : index
    %36 = vector.load %arg4[%c0_13, %c0_14] : memref<8x128xf32, #tpu.memory_space<vmem>>, vector<8x128xf32>
    tpu.vector_store %arg4[%c0_13, %c0_14], %35 {strides = array<i32>} : memref<8x128xf32, #tpu.memory_space<vmem>>, vector<8x128xf32>,
    return
  }
  func.func @transform_0(%arg0: i32) -> (i32, i32) {
    %c0_i32 = arith.constant 0 : i32
    %c0_i32_0 = arith.constant 0 : i32
    return %arg0, %c0_i32 : i32, i32
  }
  func.func @transform_1(%arg0: i32) -> (i32, i32) {
    %c0_i32 = arith.constant 0 : i32
    %c0_i32_0 = arith.constant 0 : i32
    %c0_i32_1 = arith.constant 0 : i32
    return %c0_i32, %c0_i32_0 : i32, i32
  }
  func.func @transform_2(%arg0: i32) -> (i32, i32) {
    %c0_i32 = arith.constant 0 : i32
    %c0_i32_0 = arith.constant 0 : i32
    %c0_i32_1 = arith.constant 0 : i32
    return %c0_i32, %c0_i32_0 : i32, i32
  }
  func.func @transform_3(%arg0: i32) -> (i32, i32) {
    %c0_i32 = arith.constant 0 : i32
    %c0_i32_0 = arith.constant 0 : i32
    return %arg0, %c0_i32 : i32, i32
  }
}

</mosaic_0001>

<bundles_post_ra>
// kernel: tpu_custom_call.1
= control target key start
LH: loop header
LB: loop body
LE: loop exit
PB: predicated region body
PF: predicated region fallthrough
CT: control target
= control target key end

     0   :  { %8 = vsyncpa [#allocation3], 0  ;;  %s670_s0 = inlined_call_operand.hbm [shape: f32[16,32], index: 0, kind: input, shape index: {}]   ;;  %s671_s1 = inlined_call_operand.vmem [shape: f32[1,32], index: 1, kind: input, shape index: {}]   ;;  %s672_s2 = inlined_call_operand.vmem [shape: f32[1,32], index: 2, kind: input, shape index: {}]   ;;  %s673_s3 = inlined_call_operand.hbm [shape: f32[16,32], index: 3, kind: output, shape index: {}]  }
   0x1   :  { %10 = vsyncpa [#allocation3 + $0x1], 0 }
   0x2   :  { %11 = vsyncpa [#allocation4], 0 }
   0x3   :  { %13 = vsyncpa [#allocation4 + $0x1], 0  ;;  %s499_s12 = smov 0   ;;  %s501_s13 = smov 0  }
   0x4   :  { %s503_s14 = smov 0   ;;  %s505_s15 = smov 0  }
   0x5 LB: > { %s520_s16 = sadd.s32 4294967295, %s475_s15   ;;  %s315_s17 = sadd.s32 4294967294, %s475_s15   ;;  %s475_s15 = sphi %s505_s15, %s688_s15   ;;  %s471_s14 = sphi %s503_s14, %s687_s14   ;;  %s467_s13 = sphi %s501_s13, %s686_s13   ;;  %s463_s12 = sphi %s499_s12, %s685_s12  }
   0x6   : > { %s524_s18 = sadd.s32 1, %s475_s15   ;;  %s26_s19 = sadd.s32 1, %s471_s14 }
   0x7   : > { %s23_s20 = ssub.s32 %s475_s15, %s524_s18  ;;  %p33_p0 = scmp.ne.s32.totalorder %s471_s14, %s467_s13 }
   0x8   : > { %p24_p1 = scmp.eq.s32.totalorder %s23_s20, 0  ;;  %p34_p2 = scmp.eq.s32.totalorder %s475_s15, 0 }
   0x9   : > { %p39_p3 = scmp.ne.s32.totalorder %s467_s13, %s463_s12  ;;  %p40_p4 = scmp.eq.s32.totalorder %s520_s16, 0 }
   0xa   : > { %s536_s21 = scalar_select %p24_p1, %s471_s14, %s26_s19  }
   0xb   : > { %p538_p5 = por %p34_p2, %p33_p0  ;;  %p542_p6 = por %p40_p4, %p39_p3 }
   0xc   : > { %p105_p7 = scmp.eq.s32.totalorder %s520_s16, 1  ;;  %p111_p8 = scmp.eq.s32.totalorder %s315_s17, 1 }
   0xd   : > { %p341_p10 = scmp.lt.s32.totalorder %s475_s15, 2  ;;  %s137_s26 = sand.u32 1, %s471_s14  }
   0xe   : > { %p549_p11 = por %p105_p7, %p33_p0  ;;  %p553_p12 = por %p111_p8, %p39_p3 }
   0xf   : > { %s319_s27 = sshll.u32 %s475_s15, 7  ;;  %s318_s28 = sshll.u32 %s137_s26, 3 }
  0x10   : > { %s677_s24 = scalar_select %p549_p11, 1, 0 }
  0x11   : > { %s678_s25 = scalar_select %p553_p12, 1, 0 }
  0x12   : > { %s562_s4 = scalar_lea.hbm %s670_s0, %s319_s27  ;;  %s141_s5 = scalar_lea.vmem [#allocation2], %s318_s28 }
  0x13   : > { %s148_s6 = sshll.u32 %s141_s5, 4  ;;  %p566_p13 = pnand %p341_p10, %p538_p5  ;;  %s570_s6 = int_to_ptr.vmem [resolvable:$true] %s148_s6 }
  0x14   : > { %s138_s8 = scalar_lea.sflag [#allocation3], %s137_s26  ;;  %s379_s9 = scalar_lea.hbm %s562_s4, 128 }
  0x15   : > { %p380_p2 = scmp.ne.s32.totalorder %s562_s4, %s379_s9  ;;  %p381_p3 = pneg %p566_p13 }
  0x16   : > { %s384_s17 = scalar_lea.hbm %s670_s0, 256  ;;  %p385_p5 = scmp.lt.u32.totalorder %s562_s4, %s670_s0 }
  0x17   : > { %p382_p4 = pnand %p381_p3, %p380_p2  ;;  %p386_p8 = scmp.lt.u32.totalorder %s384_s17, %s379_s9 }
  0x18   : > { %p388_p9 = scmp.lt.u32.totalorder %s379_s9, %s562_s4 }
  0x19   : > { %p383_p7 = pneg %p382_p4  ;;  %p387_p10 = por %p386_p8, %p385_p5 }
  0x1b   : > { %p389_p0 = por %p388_p9, %p387_p10 }
  0x1d   : > { %p390_p1 = pnand %p389_p0, %p383_p7 }
  0x1f   : > { %393 = shalt.err (!%p390_p1)
}
  0x20   : > { %s394_s22 = scalar_lea.vmem %s570_s6, 128  ;;  %s477_s26 = smov [#allocation2]  }
  0x21   : > { %p395_p2 = scmp.ne.s32.totalorder %s570_s6, %s394_s22  ;;  %s399_s27 = sshll.u32 %s477_s26, 4  ;;  %s400_s27 = int_to_ptr.vmem [resolvable:$false] %s399_s27 }
  0x22   : > { %s401_s28 = scalar_lea.vmem %s400_s27, 256  ;;  %p402_p11 = scmp.lt.s32.totalorder %s570_s6, %s400_s27 }
  0x23   : > { %p397_p4 = pnand %p395_p2, %p381_p3  ;;  %p403_p5 = scmp.lt.s32.totalorder %s401_s28, %s394_s22 }
  0x25   : > { %p398_p12 = pneg %p397_p4  ;;  %p404_p8 = por %p403_p5, %p402_p11 }
  0x27   : > { %p405_p9 = pnand %p404_p8, %p398_p12 }
  0x29   : > { %408 = shalt.err (!%p405_p9)
}
  0x2a   : > { %336 = dma.hbm_to_vmem [thread:$0]  (!%p566_p13), %s562_s4, 128, %s570_s6, %s138_s8  }
  0x2b   : > { %p680_p0 = scmp.lt.s32.totalorder %s475_s15, 3  ;;  %p681_p1 = scmp.ge.s32.totalorder %s475_s15, 1 }
  0x2d   : > { %p154_p3 = pnand %p681_p1, %p680_p0 }
  0x2e   : > { %s604_s29 = sand.u32 (!%p154_p3), 1, %s467_s13  }
  0x2f   : > { %157 = sbr.rel (%p154_p3) target bundleno = 263 (0x107), region = 32  ;;  %s321_s30 = sshll.u32 (!%p154_p3), %s604_s29, 3 }
  0x30   : > { %s160_s5 = scalar_lea.sflag (!%p154_p3), [#allocation3], %s604_s29  ;;  %s163_s7 = scalar_lea.vmem (!%p154_p3), [#allocation2], %s321_s30 }
  0x36   : > { %454 = dma.done.wait (%p542_p6), %s160_s5, 128  }
  0x37   : > { %456 = vsyncadd (%p542_p6), %s160_s5, 4294967168  ;;  %v187_v0 = vlaneseq  ;;  %v186_v2 = vld [vmem:[%s163_s7] sm:$0xff]  ;;  %s326_s9 = sshll.u32 %s520_s16, 7  ;;  %s185_s10 = scalar_lea.vmem [#allocation5], %s321_s30 }
  0x38   : > { %v323_v21 = vld [vmem:[%s671_s1] ss:$0 sm:$0xff]  ;;  %s245_s11 = sshll.u32 %s185_s10, 4  ;;  %s626_s20 = scalar_lea.hbm %s673_s3, %s326_s9  ;;  %s628_s11 = int_to_ptr.vmem [resolvable:$true] %s245_s11 }
  0x39   : > { %v188_v1 = vand.u32 127, %v187_v0  ;;  %v324_v23 = vld [vmem:[%s672_s2] ss:$0 sm:$0xff]  ;;  %s232_s22 = scalar_lea.sflag [#allocation4], %s604_s29  ;;  %s409_s26 = scalar_lea.vmem %s628_s11, 128 }
  0x3a   : > { %p410_p6 = scmp.ne.s32.totalorder %s628_s11, %s409_s26  ;;  %p682_p11 = scmp.ne.s32.totalorder %s677_s24, 0 }
  0x3b   : > { %vm189_vm0 = vcmp.lt.s32.totalorder %v188_v1, 32  ;;  %s478_s16 = smov [#allocation5]  }
  0x3c   : > { %v190_v3 = vsel %vm189_vm0, %v186_v2, 0.0  ;;  %p411_p12 = pnand %p410_p6, %p682_p11  ;;  %s413_s27 = sshll.u32 %s478_s16, 4  ;;  %s414_s27 = int_to_ptr.vmem [resolvable:$false] %s413_s27 }
  0x3d   : > { %191 = vadd.xlane.f32.xlu0 %v190_v3  ;;  %v193_v4 = vmul.f32 %v190_v3, %v190_v3  ;;  %s415_s28 = scalar_lea.vmem %s414_s27, 256  ;;  %p416_p7 = scmp.lt.s32.totalorder %s628_s11, %s414_s27 }
  0x3e   : > { %p412_p13 = pneg %p411_p12  ;;  %p417_p10 = scmp.lt.s32.totalorder %s415_s28, %s409_s26 }
  0x40   : > { %p418_p2 = por %p417_p10, %p416_p7 }
  0x41   : > { %194 = vadd.xlane.f32.xlu0 %v193_v4 }
  0x42   : > { %p419_p4 = pnand %p418_p2, %p412_p13 }
  0xca   : > { %v192_v5 = vpop.xlane.xlu0 %191 }
  0xcb   : > { %v196_v6 = vmul.f32 0.03125, %v192_v5 }
  0xcd   : > { %v197_v7 = vmul.f32 %v196_v6, %v196_v6  ;;  %v214_v19 = vsub.f32 %v190_v3, %v196_v6 }
  0xce   : > { %v195_v8 = vpop.xlane.xlu0 %194 }
  0xcf   : > { %v198_v9 = vmul.f32 32.0, %v197_v7 }
  0xd1   : > { %v199_v10 = vsub.f32 %v195_v8, %v198_v9 }
  0xd3   : > { %v200_v11 = vmax.f32 %v199_v10, 0.0 }
  0xd5   : > { %v201_v12 = vmul.f32 0.032258064, %v200_v11 }
  0xd7   : > { %375 = vrsqrt.f32 %v201_v12  ;;  %vm204_vm1 = vcmp.eq.f32.partialorder %v201_v12, inf  ;;  %v207_v15 = vand.u32 2147483648, %v201_v12  ;;  %vm206_vm2 = vcmp.eq.f32.partialorder %v201_v12, 0.0 }
  0xe1   : > { %v376_v13 = vpop.eup %375 }
  0xe2   : > { %v203_v14 = vmul.f32 %v376_v13, %v201_v12 }
  0xe4   : > { %v205_v16 = vsel %vm204_vm1, %v201_v12, %v203_v14 }
  0xe5   : > { %v208_v17 = vsel %vm206_vm2, %v207_v15, %v205_v16 }
  0xe6   : > { %v209_v18 = vadd.f32 1e-06, %v208_v17 }
  0xe8   : > { %377 = vrcp.f32 %v209_v18 }
  0xf2   : > { %v378_v20 = vpop.eup %377 }
  0xf3   : > { %v215_v22 = vmul.f32 %v378_v20, %v214_v19 }
  0xf5   : > { %v222_v24 = vmul.f32 %v323_v21, %v215_v22 }
  0xf7   : > { %v229_v25 = vadd.f32 %v324_v23, %v222_v24 }
  0xf9   : > { %230 = vst [vmem:[%s185_s10] sm:$0xff] %v229_v25 }
  0xfa   : > { %422 = shalt.err (!%p419_p4)
}
  0xfb   : > { %s423_s29 = scalar_lea.hbm %s626_s20, 128  ;;  %s427_s7 = scalar_lea.hbm %s673_s3, 256 }
  0xfc   : > { %p424_p5 = scmp.ne.s32.totalorder %s626_s20, %s423_s29  ;;  %p428_p0 = scmp.lt.u32.totalorder %s626_s20, %s673_s3 }
  0xfd   : > { %p429_p1 = scmp.lt.u32.totalorder %s427_s7, %s423_s29  ;;  %p431_p6 = scmp.lt.u32.totalorder %s423_s29, %s626_s20 }
  0xfe   : > { %p425_p8 = pnand %p424_p5, %p682_p11 }
  0xff   : > { %p430_p3 = por %p429_p1, %p428_p0 }
 0x100   : > { %p426_p9 = pneg %p425_p8 }
 0x101   : > { %p432_p12 = por %p431_p6, %p430_p3 }
 0x103   : > { %p433_p13 = pnand %p432_p12, %p426_p9 }
 0x105   : > { %436 = shalt.err (!%p433_p13)
}
 0x106   : > { %331 = dma.vmem_to_hbm [thread:$0]  (%p682_p11), %s628_s11, 128, %s626_s20, %s232_s22  }
 0x107 PF: > { %s257_s6 = sand.u32 1, %s463_s12   ;;  %p683_p7 = scmp.ne.s32.totalorder %s678_s25, 0 }
 0x108   : > { %p684_p10 = scmp.ge.s32.totalorder %s475_s15, 2  ;;  %s258_s8 = scalar_lea.sflag [#allocation4], %s257_s6 }
 0x10a   : > { %p338_p2 = pnand %p684_p10, %p683_p7 }
 0x10c   : > { %458 = dma.done.wait (!%p338_p2), %s258_s8, 128  }
 0x10d   : > { %460 = vsyncadd (!%p338_p2), %s258_s8, 4294967168  ;;  %p16_p4 = scmp.ge.s32.totalorder %s524_s18, 4   ;;  %s685_s12 = smov %s467_s13 }
 0x10e   : > { %s686_s13 = smov %s471_s14  ;;  %s687_s14 = smov %s536_s21 }
 0x10f   : > { %s688_s15 = smov %s524_s18  ;;  %18 = sbr.rel (!%p16_p4) target bundleno = 5 (0x5), region = 77 }
 0x116   :  { %263 = vsyncpa [#allocation3], 1 }
 0x117   :  { %265 = vsyncpa [#allocation3 + $0x1], 1 }
 0x118   :  { %266 = vsyncpa [#allocation4], 1 }
 0x119   :  { %268 = vsyncpa [#allocation4 + $0x1], 1 }

</bundles_post_ra>
